<compile_context>
chip_gen: v6e
topology: v6e:2x2x1
jax: 0.10.0
libtpu: 0.0.40
codegen_flags: <defaults>
</compile_context>

<pallas_src>
import jax
import jax.numpy as jnp
from jax import lax
from jax.experimental import pallas as pl
from jax.experimental.pallas import tpu as pltpu


def _vmem_capacity_bytes():
    """Per-core VMEM capacity (v5e/v6e: 128 MiB, v7x: 64 MiB) with a safe fallback."""
    try:
        cap = getattr(pltpu.get_tpu_info(), "vmem_capacity_bytes", None)
        if cap:
            return int(cap)
    except Exception:
        pass
    return 64 * 1024 * 1024  # conservative: v7x per-TensorCore


def rotary_positional_embedding(positions, alpha, freq, *, block_rows=None,
                                out_dtype=jnp.float32):
    """positions: (L,); alpha: (1, 1, E//2); freq: (E//2,)  ->  (L, L, E)."""
    L = int(positions.shape[0])
    e_half = int(freq.shape[0])
    E = 2 * e_half
    LE = L * E

    # TODO(synk): PyTorch's `expand(L,-1,-1) + self.alpha` (alpha shape (1,1,E//2))
    # only broadcasts when embed_size == 2 (alpha is then a per-row scalar added to
    # BOTH the sin and cos entries); for E > 2 the PyTorch module itself raises a
    # broadcast error.  We implement that exact E == 2 behaviour and extend it
    # naturally: alpha[j] is added to sin_j AND cos_j.  This is bit-exact for
    # E == 2 and for the module's zero-initialised alpha parameter.
    pos_f = positions.astype(jnp.float32).reshape(L)
    freq_f = freq.astype(jnp.float32).reshape(e_half)
    alpha_f = alpha.astype(jnp.float32).reshape(e_half)

    # Flat (1, L*E) operands laid out exactly like a row-major (L, E) table:
    # wrapper-side layout plumbing so the kernel stays purely elementwise and the
    # output stores are lane-dense (last dim = L*E).
    pos_flat = jnp.repeat(pos_f, E).reshape(1, LE)
    freq_flat = jnp.tile(jnp.tile(freq_f, 2), L).reshape(1, LE)
    alpha_flat = jnp.tile(jnp.tile(alpha_f, 2), L).reshape(1, LE)

    def kernel(pos_ref, freq_ref, alpha_ref, out_ref):
        # Recompute the tiny (1, L*E) embedding row every grid step (sub-us EUP
        # work, off the store critical path) -> no cross-step state, so the row
        # axis legally shards across TensorCores under "parallel".
        angles = pos_ref[...] * freq_ref[...]                        # (1, LE)
        lane = lax.broadcasted_iota(jnp.int32, angles.shape, 1)
        is_sin = (lane % E) < e_half                                 # sin half vs cos half
        row = jnp.where(is_sin, jnp.sin(angles), jnp.cos(angles)) + alpha_ref[...]
        row = row.astype(out_ref.dtype)
        out_ref[...] = jnp.broadcast_to(row, out_ref.shape)          # lane-dense writeback

    vmem_cap = _vmem_capacity_bytes()
    out_bytes = jnp.dtype(out_dtype).itemsize

    if block_rows is None:
        # Per-output-buffer budget ~ VMEM/8: 16 MiB on v5e/v6e (128 MiB VMEM),
        # 8 MiB on v7x (64 MiB per-TC) -> big tiles (~85% of the HBM write
        # roofline) while the double-buffered output + tiny inputs stay far
        # below the scoped limit requested below.
        budget_bytes = max(vmem_cap // 8, 1 << 20)
        max_rows = max(1, budget_bytes // (LE * out_bytes))
        if max_rows >= L:
            block_rows = L                                 # single full-array block
        else:
            block_rows = 0
            # Prefer a divisor of L that is a multiple of 8: (8,128)-legal and no
            # clipped partial writeback tile on the final grid step.
            for d in range(min(max_rows, L - 1), 7, -1):
                if d % 8 == 0 and L % d == 0:
                    block_rows = d
                    break
            if block_rows == 0:
                block_rows = max(8, (max_rows // 8) * 8)   # last tile may clip
    block_rows = int(min(block_rows, L))
    if block_rows < L and block_rows % 8 != 0:
        block_rows = max(8, (block_rows // 8) * 8)         # keep sublane dim legal
    block_rows = min(block_rows, L)

    num_blocks = pl.cdiv(L, block_rows)
    # Scoped-VMEM request: double-buffered output block + tiny inputs + headroom
    # (v5e's 16 MiB scoped default would otherwise reject the larger tiles).
    vmem_limit = int(min(vmem_cap // 2,
                         2 * block_rows * LE * out_bytes + 6 * LE * 4 + (8 << 20)))

    out_flat = pl.pallas_call(
        kernel,
        out_shape=jax.ShapeDtypeStruct((L, LE), out_dtype),
        grid=(num_blocks,),
        in_specs=[
            pl.BlockSpec((1, LE), lambda b: (0, 0)),       # grid-invariant: fetched once
            pl.BlockSpec((1, LE), lambda b: (0, 0)),
            pl.BlockSpec((1, LE), lambda b: (0, 0)),
        ],
        out_specs=pl.BlockSpec((block_rows, LE), lambda b: (b, 0)),
        compiler_params=pltpu.CompilerParams(
            dimension_semantics=("parallel",),             # stateless -> megacore-safe
            vmem_limit_bytes=vmem_limit,
        ),
        cost_estimate=pl.CostEstimate(
            flops=3 * LE * num_blocks,                     # mul + add + select per row elem
            transcendentals=2 * LE * num_blocks,           # sin + cos, recomputed per step
            bytes_accessed=L * LE * out_bytes + 3 * LE * 4,  # output writes + inputs once
        ),
    )(pos_flat, freq_flat, alpha_flat)

    return out_flat.reshape(L, L, E)


if __name__ == "__main__":
    MAX_LEN = 16       # L (also the expanded leading axis, per the PyTorch forward)
    EMBED_SIZE = 32    # E

    key = jax.random.PRNGKey(0)
    # Deterministic "positions" input (integer indices cast to float, as in torch usage).
    positions = jax.random.randint(key, (MAX_LEN,), 0, MAX_LEN).astype(jnp.float32)

    # Parameters exactly as in the module __init__ (deterministic, no checkpoint):
    alpha = jnp.zeros((1, 1, EMBED_SIZE // 2), jnp.float32)                 # nn.Parameter(zeros)
    freq = jnp.exp(jnp.arange(0, EMBED_SIZE, 2, dtype=jnp.float32)
                   * -(jnp.log(jnp.float32(10000.0)) / EMBED_SIZE))         # buffer

    out = jax.block_until_ready(rotary_positional_embedding(positions, alpha, freq))

    # Pure-JAX reference (alpha == 0 here, so this is exactly the PyTorch forward).
    angles = positions[:, None] * freq[None, :]
    emb = jnp.concatenate([jnp.sin(angles), jnp.cos(angles)], axis=-1)
    ref = jnp.broadcast_to(emb[None], (MAX_LEN, MAX_LEN, EMBED_SIZE))
    assert out.shape == (MAX_LEN, MAX_LEN, EMBED_SIZE), out.shape
    assert out.dtype == jnp.float32
    assert jnp.allclose(out, ref, atol=1e-5), "mismatch vs reference (E=32, alpha=0)"

    # E == 2 is the only embed_size for which PyTorch's `+ self.alpha` broadcast is
    # defined with nonzero alpha; verify exact semantics there as well.
    L2, E2 = 8, 2
    pos2 = jax.random.randint(jax.random.PRNGKey(1), (L2,), 0, L2).astype(jnp.float32)
    alpha2 = jnp.full((1, 1, E2 // 2), 0.37, jnp.float32)
    freq2 = jnp.exp(jnp.arange(0, E2, 2, dtype=jnp.float32)
                    * -(jnp.log(jnp.float32(10000.0)) / E2))
    out2 = jax.block_until_ready(rotary_positional_embedding(pos2, alpha2, freq2))
    ang2 = pos2[:, None] * freq2[None, :]
    emb2 = jnp.concatenate([jnp.sin(ang2), jnp.cos(ang2)], axis=-1)
    ref2 = jnp.broadcast_to(emb2[None], (L2, L2, E2)) + alpha2   # PyTorch broadcast (E==2)
    assert jnp.allclose(out2, ref2, atol=1e-5), "mismatch vs reference (E=2, alpha!=0)"

    print("KERNEL_OK")
</pallas_src>

<mosaic_0001>
module attributes {stable_mosaic.version = 11 : i64} {
  func.func @kernel(%arg0: i32, %arg1: memref<1x512xf32, #tpu.memory_space<vmem>>, %arg2: memref<1x512xf32, #tpu.memory_space<vmem>>, %arg3: memref<1x512xf32, #tpu.memory_space<vmem>>, %arg4: memref<16x512xf32, #tpu.memory_space<vmem>>) attributes {dimension_semantics = [#tpu.dimension_semantics<parallel>], iteration_bounds = array<i64: 1>, scalar_prefetch = 0 : i64, scratch_operands = 0 : i64, tpu.core_type = #tpu.core_type<tc>, window_params = [{pipeline_mode = #tpu.pipeline_mode<synchronous>, transform_indices = @transform_0, window_bounds = array<i64: 1, 512>}, {pipeline_mode = #tpu.pipeline_mode<synchronous>, transform_indices = @transform_1, window_bounds = array<i64: 1, 512>}, {pipeline_mode = #tpu.pipeline_mode<synchronous>, transform_indices = @transform_2, window_bounds = array<i64: 1, 512>}, {transform_indices = @transform_3, window_bounds = array<i64: 16, 512>}]} {
    %c0 = arith.constant 0 : index
    %c0_0 = arith.constant 0 : index
    %0 = vector.load %arg1[%c0, %c0_0] : memref<1x512xf32, #tpu.memory_space<vmem>>, vector<1x512xf32>
    %c0_1 = arith.constant 0 : index
    %c0_2 = arith.constant 0 : index
    %1 = vector.load %arg2[%c0_1, %c0_2] : memref<1x512xf32, #tpu.memory_space<vmem>>, vector<1x512xf32>
    %2 = arith.mulf %0, %1 : vector<1x512xf32>
    %3 = tpu.iota {dimensions = array<i32: 1>} : vector<1x512xi32>
    %c32_i32 = arith.constant 32 : i32
    %c0_i32 = arith.constant 0 : i32
    %4 = arith.cmpi eq, %c32_i32, %c0_i32 : i32
    %c1_i32 = arith.constant 1 : i32
    %5 = arith.select %4, %c1_i32, %c32_i32 : i32
    %6 = vector.broadcast %5 : i32 to vector<1x512xi32>
    %7 = arith.remsi %3, %6 : vector<1x512xi32>
    %c0_i32_3 = arith.constant 0 : i32
    %8 = vector.broadcast %c0_i32_3 : i32 to vector<1x512xi32>
    %9 = arith.cmpi ne, %7, %8 : vector<1x512xi32>
    %c0_i32_4 = arith.constant 0 : i32
    %10 = vector.broadcast %c0_i32_4 : i32 to vector<1x512xi32>
    %11 = arith.cmpi slt, %7, %10 : vector<1x512xi32>
    %c0_i32_5 = arith.constant 0 : i32
    %12 = arith.cmpi slt, %5, %c0_i32_5 : i32
    %13 = vector.broadcast %12 : i1 to vector<1x512xi1>
    %14 = vector.broadcast %13 : vector<1x512xi1> to vector<1x512xi1>
    %15 = arith.xori %11, %14 : vector<1x512xi1>
    %16 = arith.andi %15, %9 : vector<1x512xi1>
    %17 = vector.broadcast %5 : i32 to vector<1x512xi32>
    %18 = arith.addi %7, %17 : vector<1x512xi32>
    %19 = arith.select %16, %18, %7 : vector<1x512xi1>, vector<1x512xi32>
    %c16_i32 = arith.constant 16 : i32
    %20 = vector.broadcast %c16_i32 : i32 to vector<1x512xi32>
    %21 = arith.cmpi slt, %19, %20 : vector<1x512xi32>
    %22 = math.sin %2 : vector<1x512xf32>
    %23 = math.cos %2 : vector<1x512xf32>
    %24 = arith.select %21, %22, %23 : vector<1x512xi1>, vector<1x512xf32>
    %c0_6 = arith.constant 0 : index
    %c0_7 = arith.constant 0 : index
    %25 = vector.load %arg3[%c0_6, %c0_7] : memref<1x512xf32, #tpu.memory_space<vmem>>, vector<1x512xf32>
    %26 = arith.addf %24, %25 : vector<1x512xf32>
    %27 = vector.shape_cast %26 : vector<1x512xf32> to vector<1x512xf32>
    %28 = vector.broadcast %27 : vector<1x512xf32> to vector<16x512xf32>
    %c0_8 = arith.constant 0 : index
    %c0_9 = arith.constant 0 : index
    %29 = vector.load %arg4[%c0_8, %c0_9] : memref<16x512xf32, #tpu.memory_space<vmem>>, vector<16x512xf32>
    tpu.vector_store %arg4[%c0_8, %c0_9], %28 {strides = array<i32>} : memref<16x512xf32, #tpu.memory_space<vmem>>, vector<16x512xf32>,
    return
  }
  func.func @transform_0(%arg0: i32) -> (i32, i32) {
    %c0_i32 = arith.constant 0 : i32
    %c0_i32_0 = arith.constant 0 : i32
    %c0_i32_1 = arith.constant 0 : i32
    return %c0_i32, %c0_i32_0 : i32, i32
  }
  func.func @transform_1(%arg0: i32) -> (i32, i32) {
    %c0_i32 = arith.constant 0 : i32
    %c0_i32_0 = arith.constant 0 : i32
    %c0_i32_1 = arith.constant 0 : i32
    return %c0_i32, %c0_i32_0 : i32, i32
  }
  func.func @transform_2(%arg0: i32) -> (i32, i32) {
    %c0_i32 = arith.constant 0 : i32
    %c0_i32_0 = arith.constant 0 : i32
    %c0_i32_1 = arith.constant 0 : i32
    return %c0_i32, %c0_i32_0 : i32, i32
  }
  func.func @transform_3(%arg0: i32) -> (i32, i32) {
    %c0_i32 = arith.constant 0 : i32
    %c0_i32_0 = arith.constant 0 : i32
    return %arg0, %c0_i32 : i32, i32
  }
}

</mosaic_0001>

<bundles_post_ra>
// kernel: tpu_custom_call.1
= control target key start
LH: loop header
LB: loop body
LE: loop exit
PB: predicated region body
PF: predicated region fallthrough
CT: control target
= control target key end

     0   :  { %8 = vsyncpa [#allocation3], 0  ;;  %s622_s0 = inlined_call_operand.hbm [shape: f32[1,512], index: 0, kind: input, shape index: {}]   ;;  %s623_s1 = inlined_call_operand.hbm [shape: f32[1,512], index: 1, kind: input, shape index: {}]   ;;  %s624_s2 = inlined_call_operand.hbm [shape: f32[1,512], index: 2, kind: input, shape index: {}]   ;;  %s625_s3 = inlined_call_operand.hbm [shape: f32[16,512], index: 3, kind: output, shape index: {}]  }
   0x1   :  { %9 = vsyncpa [#allocation6], 0 }
   0x2   :  { %10 = vsyncpa [#allocation4], 0  ;;  %s545_s12 = smov [#allocation5]   ;;  %s546_s14 = smov [#allocation2]  }
   0x3   :  { %s27_s13 = sshll.u32 %s545_s12, 4  ;;  %s17_s15 = sshll.u32 %s546_s14, 4  ;;  %s28_s13 = int_to_ptr.vmem [resolvable:$true] %s27_s13  ;;  %s18_s15 = int_to_ptr.vmem [resolvable:$true] %s17_s15 }
   0x4   :  { %s467_s16 = scalar_lea.vmem %s28_s13, 64  ;;  %p472_p1 = scmp.lt.s32.totalorder %s28_s13, %s28_s13 }
   0x5   :  { %p468_p0 = scmp.ne.s32.totalorder %s28_s13, %s467_s16  ;;  %p473_p2 = scmp.lt.s32.totalorder %s467_s16, %s467_s16 }
   0x7   :  { %p474_p3 = por %p473_p2, %p472_p1 }
   0x9   :  { %p475_p4 = pnand %p474_p3, %p468_p0 }
   0xb   :  { %478 = shalt.err (!%p475_p4)
}
   0xc   :  { %30 = dma.hbm_to_vmem [thread:$0]  %s623_s1, 64, %s28_s13, [#allocation6]  }
   0xd   :  { %s487_s19 = scalar_lea.vmem %s18_s15, 64  ;;  %p492_p6 = scmp.lt.s32.totalorder %s18_s15, %s18_s15 }
   0xe   :  { %p488_p5 = scmp.ne.s32.totalorder %s18_s15, %s487_s19  ;;  %p493_p7 = scmp.lt.s32.totalorder %s487_s19, %s487_s19 }
  0x10   :  { %p494_p8 = por %p493_p7, %p492_p6 }
  0x12   :  { %p495_p9 = pnand %p494_p8, %p488_p5 }
  0x14   :  { %498 = shalt.err (!%p495_p9)
}
  0x15   :  { %20 = dma.hbm_to_vmem [thread:$0]  %s622_s0, 64, %s18_s15, [#allocation3]  }
  0x16   :  { %s547_s22 = smov [#allocation7]  }
  0x17   :  { %s37_s23 = sshll.u32 %s547_s22, 4  ;;  %s38_s23 = int_to_ptr.vmem [resolvable:$true] %s37_s23 }
  0x18   :  { %s507_s24 = scalar_lea.vmem %s38_s23, 64  ;;  %p512_p11 = scmp.lt.s32.totalorder %s38_s23, %s38_s23 }
  0x19   :  { %p508_p10 = scmp.ne.s32.totalorder %s38_s23, %s507_s24  ;;  %p513_p12 = scmp.lt.s32.totalorder %s507_s24, %s507_s24 }
  0x1b   :  { %p514_p13 = por %p513_p12, %p512_p11 }
  0x1d   :  { %p515_p0 = pnand %p514_p13, %p508_p10 }
  0x1f   :  { %518 = shalt.err (!%p515_p0)
}
  0x20   :  { %40 = dma.hbm_to_vmem [thread:$0]  %s624_s2, 64, %s38_s23, [#allocation6]  }
  0x21   :  { %539 = dma.done.wait [#allocation3], 64  }
  0x22   :  { %540 = vsyncadd [#allocation3], 4294967232 }
  0x23   :  { %541 = dma.done.wait [#allocation6], 128  }
  0x24   :  { %542 = vsyncadd [#allocation6], 4294967168  ;;  %v50_v0 = vld [vmem:[#allocation2] sm:$0xf]  ;;  %v51_v1 = vld [vmem:[#allocation5] sm:$0xf] }
  0x25   :  { %v586_v2 = vmul.f32 %v51_v1, %v50_v0  ;;  %v548_v14 = vmov 683565275   ;;  %v549_v16 = vmov 2475754826   ;;  %v550_v18 = vmov 2131351028  }
  0x26   :  { %v551_v20 = vmov 2102212464   ;;  %v552_v22 = vmov 920167782   ;;  %v553_v29 = vmov 1326507024  }
  0x27   :  { %v113_v3 = vand.u32 2139095040, %v586_v2  ;;  %v110_v5 = vand.u32 2147483647, %v586_v2  ;;  %vm112_vm7 = vcmp.lt.s32.totalorder %v586_v2, 0  ;;  %s554_s0 = smov [#allocation8]  }
  0x28   :  { %s418_s2 = sshll.u32 %s554_s0, 4  ;;  %s419_s2 = int_to_ptr.vmem [resolvable:$true] %s418_s2 }
  0x29   :  { %v114_v4 = vshrl.u32 %v113_v3, 23  ;;  %v117_v8 = vand.u32 8388607, %v110_v5  ;;  %vm111_vm8 = vcmp.le.f32.partialorder %v110_v5, 0.7853982  ;;  %s519_s26 = scalar_lea.vmem %s419_s2, 1024  ;;  %p524_p2 = scmp.lt.s32.totalorder %s419_s2, %s419_s2 }
  0x2a   :  { %p520_p1 = scmp.ne.s32.totalorder %s419_s2, %s519_s26  ;;  %p525_p3 = scmp.lt.s32.totalorder %s519_s26, %s519_s26 }
  0x2b   :  { %v431_v6 = vadd.s32 4294967169, %v114_v4  ;;  %v118_v11 = vor.u32 8388608, %v117_v8 }
  0x2c   :  { %p526_p4 = por %p525_p3, %p524_p2 }
  0x2d   :  { %v120_v7 = vadd.s32 1, %v431_v6  ;;  %v158_v31 = vshll.u32 %v118_v11, 8 }
  0x2e   :  { %p527_p5 = pnand %p526_p4, %p520_p1 }
  0x2f   :  { %vm121_vm0 = vcmp.gt.s32.totalorder %v120_v7, 0 }
  0x30   :  { %v122_v9 = vsel %vm121_vm0, %v120_v7, 0  ;;  %vm202_vm0 = vweird.f32 %v586_v2 }
  0x31   :  { %v124_v10 = vand.u32 31, %v122_v9  ;;  %v123_v12 = vshrl.u32 %v122_v9, 5 }
  0x33   :  { %v125_v13 = vsub.s32 32, %v124_v10  ;;  %v127_v15 = vshll.u32 %v548_v14, %v124_v10  ;;  %v130_v17 = vshll.u32 %v549_v16, %v124_v10  ;;  %v133_v19 = vshll.u32 %v550_v18, %v124_v10 }
  0x34   :  { %v136_v21 = vshll.u32 %v551_v20, %v124_v10  ;;  %v139_v23 = vshll.u32 %v552_v22, %v124_v10  ;;  %vm142_vm1 = vcmp.lt.s32.totalorder %v123_v12, 1  ;;  %vm145_vm2 = vcmp.lt.s32.totalorder %v123_v12, 4 }
  0x35   :  { %v126_v24 = vshrl.u32 %v548_v14, %v125_v13  ;;  %v128_v25 = vshrl.u32 %v549_v16, %v125_v13  ;;  %v131_v26 = vshrl.u32 %v550_v18, %v125_v13  ;;  %v134_v27 = vshrl.u32 %v551_v20, %v125_v13 }
  0x36   :  { %v137_v28 = vshrl.u32 %v552_v22, %v125_v13  ;;  %v140_v30 = vshrl.u32 %v553_v29, %v125_v13  ;;  %vm143_vm3 = vcmp.lt.s32.totalorder %v123_v12, 2  ;;  %vm144_vm4 = vcmp.lt.s32.totalorder %v123_v12, 3 }
  0x37   :  { %v129_v32 = vor.u32 %v128_v25, %v127_v15  ;;  %v132_v33 = vor.u32 %v131_v26, %v130_v17  ;;  %v135_v34 = vor.u32 %v134_v27, %v133_v19 }
  0x38   :  { %v138_v35 = vor.u32 %v137_v28, %v136_v21  ;;  %v141_v36 = vor.u32 %v140_v30, %v139_v23  ;;  %v53_v21 = vlaneseq }
  0x39   :  { %v146_v37 = vsel %vm142_vm1, %v126_v24, %v129_v32  ;;  %v147_v38 = vsel %vm145_vm2, %v135_v34, 2102212464  ;;  %v150_v39 = vsel %vm142_vm1, %v129_v32, %v132_v33  ;;  %v154_v40 = vsel %vm142_vm1, %v132_v33, %v135_v34 }
  0x3a   :  { %v148_v41 = vsel %vm144_vm4, %v132_v33, %v147_v38  ;;  %v151_v42 = vsel %vm145_vm2, %v138_v35, 920167782  ;;  %v155_v43 = vsel %vm145_vm2, %v141_v36, 1326507024  ;;  %v54_v23 = vand.u32 127, %v53_v21 }
  0x3b   :  { %v152_v44 = vsel %vm144_vm4, %v135_v34, %v151_v42  ;;  %v156_v45 = vsel %vm144_vm4, %v138_v35, %v155_v43  ;;  %v149_v46 = vsel %vm143_vm3, %v146_v37, %v148_v41  ;;  %v319_v25 = vshrl.u32 %v53_v21, 7  ;;  %v363_v37 = vld [vmem:[#allocation7] sm:$0xf] }
  0x3c   :  { %v153_v47 = vsel %vm143_vm3, %v150_v39, %v152_v44  ;;  %v157_v48 = vsel %vm143_vm3, %v154_v40, %v156_v45  ;;  %v165_v53 = vmul.u32 %v158_v31, %v149_v46  ;;  %v62_v26 = vand.u32 31, %v54_v23 }
  0x3d   :  { %v592_v49 = vmul.u32.u64.low %v158_v31, %v157_v48  ;;  %v593_v50 = vmul.u32.u64.high %v158_v31, %v157_v48, %v592_v49  ;;  %v595_v51 = vmul.u32.u64.low %v158_v31, %v153_v47  ;;  %v596_v52 = vmul.u32.u64.high %v158_v31, %v153_v47, %v595_v51 }
  0x3e   :  { %v55_v29 = vadd.s32 128, %v54_v23  ;;  %v56_v30 = vadd.s32 256, %v54_v23  ;;  %v57_v31 = vadd.s32 384, %v54_v23  ;;  %v320_v32 = vsub.s32 0, %v319_v25 }
  0x3f   :  { %vm167_vm5 = vc.u32 %v593_v50, %v595_v51  ;;  %v168_v54 = vadd.s32 1, %v596_v52  ;;  %v166_v1 = vadd.s32 %v595_v51, %v593_v50  ;;  %v324_v5 = vsub.s32 1, %v319_v25 }
  0x40   :  { %v328_v33 = vsub.s32 2, %v319_v25  ;;  %v332_v34 = vsub.s32 3, %v319_v25  ;;  %vm606_vm9 = vcmp.lt.s32.totalorder %v62_v26, 16  ;;  %v69_v38 = vand.u32 31, %v55_v29 }
  0x41   :  { %v169_v55 = vsel %vm167_vm5, %v168_v54, %v596_v52  ;;  %v76_v41 = vand.u32 31, %v56_v30  ;;  %v83_v43 = vand.u32 31, %v57_v31  ;;  %v368_v46 = vrot.slane %v363_v37, %v320_v32 }
  0x42   :  { %v170_v56 = vadd.s32 %v169_v55, %v165_v53  ;;  %vm611_vm1 = vcmp.lt.s32.totalorder %v69_v38, 16  ;;  %v372_v50 = vrot.slane %v363_v37, %v324_v5  ;;  %v376_v53 = vrot.slane %v363_v37, %v328_v33 }
  0x43   :  { %v380_v54 = vrot.slane %v363_v37, %v332_v34  ;;  %vm108_vm2 = vcmp.lt.s32.totalorder %v76_v41, 16  ;;  %vm109_vm3 = vcmp.lt.s32.totalorder %v83_v43, 16 }
  0x44   :  { %v171_v57 = vadd.s32 536870912, %v170_v56 }
  0x46   :  { %v172_v58 = vshrl.u32 %v171_v57, 30 }
  0x48   :  { %v173_v59 = vshll.u32 %v172_v58, 30  ;;  %v196_v16 = vsub.s32 4, %v172_v58 }
  0x4a   :  { %v174_v60 = vsub.s32 %v170_v56, %v173_v59  ;;  %v197_v19 = vsel %vm112_vm7, %v196_v16, %v172_v58 }
  0x4b   :  { %v199_v22 = vsel %vm111_vm8, 0, %v197_v19 }
  0x4c   :  { %v176_v61 = vsub.s32 0, %v174_v60  ;;  %v203_v24 = vadd.s32 3, %v199_v22  ;;  %v307_v28 = vand.u32 3, %v199_v22 }
  0x4e   :  { %v432_v62 = vmin.u32 %v176_v61, %v174_v60  ;;  %v204_v27 = vand.u32 3, %v203_v24  ;;  %vm312_vm11 = vcmp.eq.s32.totalorder %v307_v28, 2  ;;  %vm309_vm13 = vcmp.eq.s32.totalorder %v307_v28, 0 }
  0x4f   :  { %vm308_vm15 = vcmp.lt.s32.totalorder %v307_v28, 2 }
  0x50   :  { %v178_v63 = vclz %v432_v62  ;;  %vm209_vm10 = vcmp.eq.s32.totalorder %v204_v27, 2  ;;  %vm206_vm12 = vcmp.eq.s32.totalorder %v204_v27, 0  ;;  %vm205_vm14 = vcmp.lt.s32.totalorder %v204_v27, 2 }
  0x52   :  { %v433_v0 = vadd.s32 4294967294, %v178_v63 }
  0x54   :  { %vm434_vm6 = vcmp.lt.s32.totalorder %v433_v0, 0 }
  0x55   :  { %v181_v3 = vsel %vm434_vm6, 0, %v433_v0 }
  0x56   :  { %v182_v4 = vsub.s32 32, %v181_v3  ;;  %v183_v6 = vshll.u32 %v174_v60, %v181_v3  ;;  %v186_v7 = vsub.s32 4294967266, %v181_v3 }
  0x58   :  { %v184_v8 = vshrl.u32 %v166_v1, %v182_v4  ;;  %v187_v9 = vadd.s32 127, %v186_v7 }
  0x5a   :  { %v185_v10 = vor.u32 %v184_v8, %v183_v6  ;;  %v188_v11 = vshll.u32 %v187_v9, 23 }
  0x5c   :  { %v189_v12 = vor.u32 4788187, %v188_v11  ;;  %v192_v13 = vcvt.s32.f32 %v185_v10 }
  0x5e   :  { %v190_v14 = vand.u32 2147483647, %v189_v12 }
  0x60   :  { %v193_v15 = vmul.f32 %v192_v13, %v190_v14 }
  0x62   :  { %v194_v17 = vxor.u32 2147483648, %v193_v15 }
  0x64   :  { %v195_v18 = vsel %vm112_vm7, %v194_v17, %v193_v15 }
  0x65   :  { %v198_v20 = vsel %vm111_vm8, %v586_v2, %v195_v18 }
  0x66   :  { %455 = vcosq.f32 %v198_v20 }
  0x67   :  { %457 = vsinq.f32 %v198_v20 }
  0x73   :  { %v456_v35 = vpop.eup %455 }
  0x74   :  { %v458_v39 = vpop.eup %457  ;;  %v210_v40 = vxor.u32 2147483648, %v456_v35 }
  0x75   :  { %v207_v42 = vxor.u32 2147483648, %v458_v39 }
  0x76   :  { %v211_v44 = vsel %vm209_vm10, %v210_v40, %v458_v39  ;;  %v314_v45 = vsel %vm312_vm11, %v210_v40, %v458_v39 }
  0x77   :  { %v208_v47 = vsel %vm206_vm12, %v456_v35, %v207_v42  ;;  %v311_v48 = vsel %vm309_vm13, %v456_v35, %v207_v42 }
  0x78   :  { %v212_v51 = vsel %vm205_vm14, %v208_v47, %v211_v44  ;;  %v315_v52 = vsel %vm308_vm15, %v311_v48, %v314_v45 }
  0x79   :  { %v213_v55 = vsel %vm202_vm0, nan, %v212_v51  ;;  %v316_v56 = vsel %vm202_vm0, nan, %v315_v52 }
  0x7a   :  { %v321_v57 = vrot.slane %v213_v55, %v320_v32  ;;  %v342_v2 = vrot.slane %v316_v56, %v320_v32  ;;  %v325_v58 = vrot.slane %v213_v55, %v324_v5  ;;  %v346_v59 = vrot.slane %v316_v56, %v324_v5 }
  0x7b   :  { %v329_v60 = vrot.slane %v213_v55, %v328_v33  ;;  %v350_v61 = vrot.slane %v316_v56, %v328_v33  ;;  %v333_v62 = vrot.slane %v213_v55, %v332_v34  ;;  %v354_v63 = vrot.slane %v316_v56, %v332_v34 }
  0x7c   :  { %v359_v0 = vsel %vm606_vm9, %v321_v57, %v342_v2  ;;  %v360_v1 = vsel %vm611_vm1, %v325_v58, %v346_v59 }
  0x7d   :  { %v385_v3 = vadd.f32 %v368_v46, %v359_v0  ;;  %v386_v4 = vadd.f32 %v372_v50, %v360_v1  ;;  %v361_v6 = vsel %vm108_vm2, %v329_v60, %v350_v61  ;;  %v362_v7 = vsel %vm109_vm3, %v333_v62, %v354_v63 }
  0x7e   :  { %v387_v8 = vadd.f32 %v376_v53, %v361_v6  ;;  %v388_v9 = vadd.f32 %v380_v54, %v362_v7 }
  0x7f   :  { %v392_v10 = vrot.slane %v385_v3, %v320_v32  ;;  %v396_v11 = vrot.slane %v386_v4, %v320_v32 }
  0x80   :  { %v400_v12 = vrot.slane %v387_v8, %v320_v32  ;;  %v404_v13 = vrot.slane %v388_v9, %v320_v32 }
  0x81   :  { %405 = vst [vmem:[#allocation8] sm:$0xff] %v392_v10  ;;  %409 = vst [vmem:[#allocation8 + $0x20] sm:$0xff] %v392_v10 }
  0x82   :  { %406 = vst [vmem:[#allocation8 + $0x8] sm:$0xff] %v396_v11  ;;  %410 = vst [vmem:[#allocation8 + $0x28] sm:$0xff] %v396_v11 }
  0x83   :  { %407 = vst [vmem:[#allocation8 + $0x10] sm:$0xff] %v400_v12  ;;  %411 = vst [vmem:[#allocation8 + $0x30] sm:$0xff] %v400_v12 }
  0x84   :  { %408 = vst [vmem:[#allocation8 + $0x18] sm:$0xff] %v404_v13  ;;  %412 = vst [vmem:[#allocation8 + $0x38] sm:$0xff] %v404_v13 }
  0x85   :  { %530 = shalt.err (!%p527_p5)
}
  0x86   :  { %s555_s27 = smov 512   ;;  %s556_s28 = smov 32  }
  0x87   :  { %424 = dma.vmem_to_hbm [thread:$0]  %s419_s2, 1024, %s625_s3, [#allocation4], %s555_s27, %s555_s27, %s556_s28  }
  0x88   :  { %543 = dma.done.wait [#allocation4], 1024  }
  0x89   :  { %544 = vsyncadd [#allocation4], 4294966272 }
  0x8a   :  { %428 = vsyncpa [#allocation3], 1 }
  0x8b   :  { %429 = vsyncpa [#allocation6], 1 }
  0x8c   :  { %430 = vsyncpa [#allocation4], 1 }

</bundles_post_ra>
